<compile_context>
chip_gen: v6e
topology: v6e:2x2x1
jax: 0.10.0
libtpu: 0.0.40
codegen_flags: <defaults>
</compile_context>

<pallas_src>
import jax
import jax.numpy as jnp
from jax import lax
from jax.experimental import pallas as pl
from jax.experimental.pallas import tpu as pltpu

NEG = 1e9  # additive-mask sentinel: large enough to zero out after exp / lose the max, small
           # enough to avoid f32 overflow if it ever leaks into downstream matmuls.


def _round_up(v, m):
    return -(-v // m) * m


def _make_kernel(N, F, H, G, C, r_vec, r_w1max, r_w1sum, r_w2):
    """Fused GATConv(heads=1) + ReLU + global max/sum pool + Linear/ReLU + Linear + log_softmax."""

    def kernel(x_ref, node_ref, par_ref, out_ref):
        # ---- GATConv ----
        # W_aug = [w_gat | w_gat @ att_dst^T]  ([F, H+1]): one MXU pass yields xw and a_dst.
        w_aug = par_ref[0:F, 0:H + 1]
        xw_aug = jnp.dot(x_ref[...], w_aug, preferred_element_type=jnp.float32)   # [N, H+1]
        xw = xw_aug[:, :H]                                                        # [N, H]
        a_dst = xw_aug[:, H:H + 1]                                                # [N, 1]

        att_src = par_ref[r_vec:r_vec + 1, 0:H]                                   # [1, H]
        a_src_row = lax.dot_general(att_src, xw, (((1,), (1,)), ((), ())),
                                    preferred_element_type=jnp.float32)           # [1, N]

        # e[i, j] = leaky_relu(a_dst[i] + a_src[j], 0.2) + adj_bias[i, j]
        e = a_dst + a_src_row                                                     # [N, N]
        e = jnp.maximum(e, 0.2 * e)                                               # leaky_relu(0.2)
        e = e + node_ref[0:N, 0:N]                                                # 0 on edge, -NEG off

        # softmax over source nodes j (self loops guarantee a finite row max);
        # masked entries underflow to exactly 0 after exp -> no explicit mask multiply needed.
        e = e - jnp.max(e, axis=-1, keepdims=True)
        p = jnp.exp(e)
        attn = p * pl.reciprocal(jnp.sum(p, axis=-1, keepdims=True), approx=True)

        b_gat = par_ref[r_vec + 1:r_vec + 2, 0:H]
        feat = jnp.dot(attn, xw, preferred_element_type=jnp.float32) + b_gat      # [N, H]
        feat = jnp.maximum(feat, 0.0)                                             # F.relu

        # ---- global pooling ----
        pmask_t = node_ref[0:N, N:N + G]            # [N, G] one-hot (sum pool via MXU)
        gbias = node_ref[0:N, N + G:N + 2 * G]      # [N, G] 0 / -NEG (max pool additive mask)

        sum_f = lax.dot_general(pmask_t, feat, (((0,), (0,)), ((), ())),
                                preferred_element_type=jnp.float32)               # [G, H]

        rows = []
        for g in range(G):  # statically unrolled; per-graph bias precomputed in wrapper
            rows.append(jnp.max(feat + gbias[:, g:g + 1], axis=0, keepdims=True))  # [1, H]
        max_f = jnp.concatenate(rows, axis=0)                                       # [G, H]

        # ---- Linear(2H -> H) on cat([max_f, sum_f], -1) via split weights, ReLU ----
        w1_max = par_ref[r_w1max:r_w1max + H, 0:H]
        w1_sum = par_ref[r_w1sum:r_w1sum + H, 0:H]
        b1 = par_ref[r_vec + 2:r_vec + 3, 0:H]
        hidden = (jnp.dot(max_f, w1_max, preferred_element_type=jnp.float32)
                  + jnp.dot(sum_f, w1_sum, preferred_element_type=jnp.float32)
                  + b1)
        hidden = jnp.maximum(hidden, 0.0)
        # (dropout = identity in eval mode)

        # ---- Linear(H -> C) + log_softmax ----
        w2 = par_ref[r_w2:r_w2 + H, 0:C]
        b2 = par_ref[r_vec + 3:r_vec + 4, 0:C]
        logits = jnp.dot(hidden, w2, preferred_element_type=jnp.float32) + b2

        z = logits - jnp.max(logits, axis=-1, keepdims=True)
        lse = jnp.log(jnp.sum(jnp.exp(z), axis=-1, keepdims=True))
        out_ref[...] = z - lse

    return kernel


def graph_network(x, edge_index, graph_batch, num_graphs,
                  w_gat, att_src, att_dst, b_gat, w1, b1, w2, b2):
    """Fused forward pass. x:[N,F], edge_index:[2,E], graph_batch:[N] (sorted graph ids)."""
    N, F = x.shape
    H = w_gat.shape[1]
    G = int(num_graphs)
    C = w2.shape[1]
    assert N + 2 * G <= 128 and H + 1 <= 128, "single lane-tile packing assumption (small-N path)"

    # ---- node-side pack [N, N+2G]: additive adjacency bias | pooling one-hot | pooling bias ----
    src, dst = edge_index[0], edge_index[1]
    adj_bias = jnp.full((N, N), -NEG, jnp.float32).at[dst, src].set(0.0)
    adj_bias = adj_bias.at[jnp.arange(N), jnp.arange(N)].set(0.0)      # add_self_loops=True
    pmask_t = jnp.zeros((N, G), jnp.float32).at[jnp.arange(N), graph_batch].set(1.0)
    gbias = (pmask_t - 1.0) * NEG
    node_pack = jnp.concatenate([adj_bias, pmask_t, gbias], axis=1)    # [N, N+2G]

    # ---- parameter slab [rows, 128]: 9 small tensors -> one DMA, segments sublane-aligned ----
    Hr = _round_up(H, 8)
    r_vec = _round_up(F, 8)        # rows r_vec..r_vec+3: att_src, b_gat, b1, b2
    r_w1max = r_vec + 8
    r_w1sum = r_w1max + Hr
    r_w2 = r_w1sum + Hr
    rows = _round_up(r_w2 + Hr, 8)

    w_aug = jnp.concatenate([w_gat, jnp.dot(w_gat, att_dst.reshape(H, 1))], axis=1)  # [F, H+1]
    par = jnp.zeros((rows, 128), jnp.float32)
    par = par.at[0:F, 0:H + 1].set(w_aug)
    par = par.at[r_vec:r_vec + 1, 0:H].set(att_src.reshape(1, H))
    par = par.at[r_vec + 1:r_vec + 2, 0:H].set(b_gat.reshape(1, H))
    par = par.at[r_vec + 2:r_vec + 3, 0:H].set(b1.reshape(1, H))
    par = par.at[r_vec + 3:r_vec + 4, 0:C].set(b2.reshape(1, C))
    par = par.at[r_w1max:r_w1max + H, 0:H].set(w1[:H])
    par = par.at[r_w1sum:r_w1sum + H, 0:H].set(w1[H:])
    par = par.at[r_w2:r_w2 + H, 0:C].set(w2)

    cost = pl.CostEstimate(
        flops=(2 * N * F * (H + 1) + 2 * N * H + 2 * N * N * H
               + 2 * N * G * H + 4 * G * H * H + 2 * G * H * C),
        transcendentals=N * N + N + G * C + G,
        bytes_accessed=4 * (x.size + node_pack.size + par.size + G * C),
    )

    kernel = _make_kernel(N, F, H, G, C, r_vec, r_w1max, r_w1sum, r_w2)
    return pl.pallas_call(
        kernel,
        out_shape=jax.ShapeDtypeStruct((G, C), jnp.float32),
        in_specs=[pl.BlockSpec(memory_space=pltpu.MemorySpace.VMEM)] * 3,
        out_specs=pl.BlockSpec(memory_space=pltpu.MemorySpace.VMEM),
        cost_estimate=cost,
    )(x, node_pack, par)


# ----------------------------------------- main -----------------------------------------
if __name__ == "__main__":
    key = jax.random.PRNGKey(0)
    N, F, H, G, C, E = 16, 8, 32, 2, 4, 24   # nodes, feature_dim, hidden, graphs, classes, edges
    ks = jax.random.split(key, 12)

    # ----- inputs -----
    x = jax.random.normal(ks[0], (N, F), jnp.float32)
    src = jax.random.randint(ks[1], (E,), 0, N)
    dst = jax.random.randint(ks[2], (E,), 0, N)
    edge_index = jnp.stack([src, dst])                       # [2, E]
    edge_type = jax.random.randint(ks[3], (E,), 0, 3)        # unused by forward (FiLMConv unused)
    # guarantee every graph id appears at least once (non-empty-graph assumption for max-pool)
    graph_batch = jnp.sort(jnp.concatenate(
        [jnp.arange(G), jax.random.randint(ks[4], (N - G,), 0, G)]))

    # ----- deterministic parameters -----
    # GATConv(F -> H, heads=1): lin weight (no bias), att_src/att_dst [1, H], out bias [1, H]
    w_gat = jax.random.normal(ks[5], (F, H), jnp.float32) * 0.2
    att_src = jax.random.normal(ks[6], (1, H), jnp.float32) * 0.2
    att_dst = jax.random.normal(ks[7], (1, H), jnp.float32) * 0.2
    b_gat = jax.random.normal(ks[8], (1, H), jnp.float32) * 0.05
    # Linear(2H -> H), Linear(H -> C)
    w1 = jax.random.normal(ks[9], (2 * H, H), jnp.float32) * 0.1
    b1 = jax.random.normal(ks[10], (1, H), jnp.float32) * 0.1
    w2 = jax.random.normal(ks[11], (H, C), jnp.float32) * 0.1
    b2 = jnp.zeros((1, C), jnp.float32)

    # ----- run fused kernel -----
    out = graph_network(x, edge_index, graph_batch, G,
                        w_gat, att_src, att_dst, b_gat, w1, b1, w2, b2)
    out = jax.block_until_ready(out)

    # ----- pure-JAX reference (sanity check) -----
    hp = jax.lax.Precision.HIGHEST
    adj = jnp.zeros((N, N), jnp.float32).at[dst, src].set(1.0)
    adj = adj.at[jnp.arange(N), jnp.arange(N)].set(1.0)
    pmask = jnp.zeros((G, N), jnp.float32).at[graph_batch, jnp.arange(N)].set(1.0)
    xw = jnp.dot(x, w_gat, precision=hp)
    a_s = jnp.sum(xw * att_src, -1, keepdims=True)
    a_d = jnp.sum(xw * att_dst, -1, keepdims=True)
    e = a_d + a_s.T
    e = jnp.where(e > 0, e, 0.2 * e)
    e = jnp.where(adj > 0, e, -1e30)
    e = e - e.max(-1, keepdims=True)
    p = jnp.exp(e) * adj
    attn = p / p.sum(-1, keepdims=True)
    feats_ref = jax.nn.relu(jnp.dot(attn, xw, precision=hp) + b_gat)
    sum_f = jnp.dot(pmask, feats_ref, precision=hp)
    max_f = jnp.where(pmask[:, :, None] > 0, feats_ref[None], -1e30).max(1)
    hid = jax.nn.relu(jnp.dot(jnp.concatenate([max_f, sum_f], -1), w1, precision=hp) + b1)
    ref_out = jax.nn.log_softmax(jnp.dot(hid, w2, precision=hp) + b2, -1)

    assert out.shape == (G, C)
    assert jnp.allclose(out, ref_out, atol=5e-2, rtol=5e-2), "kernel mismatch vs reference"

    print("KERNEL_OK")
</pallas_src>

<mosaic_0001>
module attributes {stable_mosaic.version = 11 : i64} {
  func.func @kernel(%arg0: memref<16x8xf32, #tpu.memory_space<vmem>>, %arg1: memref<16x20xf32, #tpu.memory_space<vmem>>, %arg2: memref<112x128xf32, #tpu.memory_space<vmem>>, %arg3: memref<2x4xf32, #tpu.memory_space<vmem>>) attributes {dimension_semantics = [], scalar_prefetch = 0 : i64, scratch_operands = 0 : i64, tpu.core_type = #tpu.core_type<tc>} {
    %c0 = arith.constant 0 : index
    %c0_0 = arith.constant 0 : index
    %0 = vector.load %arg2[%c0, %c0_0] : memref<112x128xf32, #tpu.memory_space<vmem>>, vector<8x33xf32>
    %c0_1 = arith.constant 0 : index
    %c0_2 = arith.constant 0 : index
    %1 = vector.load %arg0[%c0_1, %c0_2] : memref<16x8xf32, #tpu.memory_space<vmem>>, vector<16x8xf32>
    %cst = arith.constant dense<0.000000e+00> : vector<16x33xf32>
    %2 = tpu.matmul %1, %0, %cst {dimension_numbers = #tpu.dot_dimension_numbers<[1], [0], [0], [1], [0, 0, 1, 1], [], []>} : vector<16x8xf32>, vector<8x33xf32>, vector<16x33xf32> -> vector<16x33xf32>
    %3 = vector.extract_strided_slice %2 {offsets = [0, 0], sizes = [16, 32], strides = [1, 1]} : vector<16x33xf32> to vector<16x32xf32>
    %4 = vector.extract_strided_slice %2 {offsets = [0, 32], sizes = [16, 1], strides = [1, 1]} : vector<16x33xf32> to vector<16x1xf32>
    %c8 = arith.constant 8 : index
    %c0_3 = arith.constant 0 : index
    %5 = vector.load %arg2[%c8, %c0_3] : memref<112x128xf32, #tpu.memory_space<vmem>>, vector<1x32xf32>
    %cst_4 = arith.constant dense<0.000000e+00> : vector<1x16xf32>
    %6 = tpu.matmul %5, %3, %cst_4 {dimension_numbers = #tpu.dot_dimension_numbers<[1], [1], [0], [0], [0, 0, 1, 0], [], []>} : vector<1x32xf32>, vector<16x32xf32>, vector<1x16xf32> -> vector<1x16xf32>
    %7 = vector.broadcast %4 : vector<16x1xf32> to vector<16x16xf32>
    %8 = vector.broadcast %6 : vector<1x16xf32> to vector<16x16xf32>
    %9 = arith.addf %7, %8 : vector<16x16xf32>
    %cst_5 = arith.constant 2.000000e-01 : f32
    %10 = vector.broadcast %cst_5 : f32 to vector<16x16xf32>
    %11 = arith.mulf %10, %9 : vector<16x16xf32>
    %12 = arith.maximumf %9, %11 : vector<16x16xf32>
    %c0_6 = arith.constant 0 : index
    %c0_7 = arith.constant 0 : index
    %13 = vector.load %arg1[%c0_6, %c0_7] : memref<16x20xf32, #tpu.memory_space<vmem>>, vector<16x16xf32>
    %14 = arith.addf %12, %13 : vector<16x16xf32>
    %cst_8 = arith.constant dense<0xFF800000> : vector<16xf32>
    %15 = vector.multi_reduction <maximumf>, %14, %cst_8 [1] : vector<16x16xf32> to vector<16xf32>
    %16 = vector.shape_cast %15 : vector<16xf32> to vector<16x1xf32>
    %17 = vector.broadcast %16 : vector<16x1xf32> to vector<16x16xf32>
    %18 = arith.subf %14, %17 : vector<16x16xf32>
    %19 = math.exp %18 : vector<16x16xf32>
    %cst_9 = arith.constant dense<0.000000e+00> : vector<16xf32>
    %20 = vector.multi_reduction <add>, %19, %cst_9 [1] : vector<16x16xf32> to vector<16xf32>
    %21 = vector.shape_cast %20 : vector<16xf32> to vector<16x1xf32>
    %22 = tpu.reciprocal %21 {approx = true} : vector<16x1xf32> -> vector<16x1xf32>
    %23 = vector.broadcast %22 : vector<16x1xf32> to vector<16x16xf32>
    %24 = arith.mulf %19, %23 : vector<16x16xf32>
    %c9 = arith.constant 9 : index
    %c0_10 = arith.constant 0 : index
    %25 = vector.load %arg2[%c9, %c0_10] : memref<112x128xf32, #tpu.memory_space<vmem>>, vector<1x32xf32>
    %cst_11 = arith.constant dense<0.000000e+00> : vector<16x32xf32>
    %26 = tpu.matmul %24, %3, %cst_11 {dimension_numbers = #tpu.dot_dimension_numbers<[1], [0], [0], [1], [0, 0, 1, 1], [], []>} : vector<16x16xf32>, vector<16x32xf32>, vector<16x32xf32> -> vector<16x32xf32>
    %27 = vector.broadcast %25 : vector<1x32xf32> to vector<16x32xf32>
    %28 = arith.addf %26, %27 : vector<16x32xf32>
    %cst_12 = arith.constant 0.000000e+00 : f32
    %29 = vector.broadcast %cst_12 : f32 to vector<16x32xf32>
    %30 = arith.maximumf %28, %29 : vector<16x32xf32>
    %c0_13 = arith.constant 0 : index
    %c16 = arith.constant 16 : index
    %31 = vector.load %arg1[%c0_13, %c16] : memref<16x20xf32, #tpu.memory_space<vmem>>, vector<16x2xf32>
    %c0_14 = arith.constant 0 : index
    %c18 = arith.constant 18 : index
    %32 = vector.load %arg1[%c0_14, %c18] : memref<16x20xf32, #tpu.memory_space<vmem>>, vector<16x2xf32>
    %cst_15 = arith.constant dense<0.000000e+00> : vector<2x32xf32>
    %33 = tpu.matmul %31, %30, %cst_15 {dimension_numbers = #tpu.dot_dimension_numbers<[0], [0], [1], [1], [0, 1, 1, 1], [], []>} : vector<16x2xf32>, vector<16x32xf32>, vector<2x32xf32> -> vector<2x32xf32>
    %34 = vector.extract_strided_slice %32 {offsets = [0, 0], sizes = [16, 1], strides = [1, 1]} : vector<16x2xf32> to vector<16x1xf32>
    %35 = vector.broadcast %34 : vector<16x1xf32> to vector<16x32xf32>
    %36 = arith.addf %30, %35 : vector<16x32xf32>
    %cst_16 = arith.constant dense<0xFF800000> : vector<32xf32>
    %37 = vector.multi_reduction <maximumf>, %36, %cst_16 [0] : vector<16x32xf32> to vector<32xf32>
    %38 = vector.shape_cast %37 : vector<32xf32> to vector<1x32xf32>
    %39 = vector.extract_strided_slice %32 {offsets = [0, 1], sizes = [16, 1], strides = [1, 1]} : vector<16x2xf32> to vector<16x1xf32>
    %40 = vector.broadcast %39 : vector<16x1xf32> to vector<16x32xf32>
    %41 = arith.addf %30, %40 : vector<16x32xf32>
    %cst_17 = arith.constant dense<0xFF800000> : vector<32xf32>
    %42 = vector.multi_reduction <maximumf>, %41, %cst_17 [0] : vector<16x32xf32> to vector<32xf32>
    %43 = vector.shape_cast %42 : vector<32xf32> to vector<1x32xf32>
    %44 = tpu.concatenate %38, %43 in 0 : vector<1x32xf32>, vector<1x32xf32> -> vector<2x32xf32>
    %c16_18 = arith.constant 16 : index
    %c0_19 = arith.constant 0 : index
    %45 = vector.load %arg2[%c16_18, %c0_19] : memref<112x128xf32, #tpu.memory_space<vmem>>, vector<32x32xf32>
    %c48 = arith.constant 48 : index
    %c0_20 = arith.constant 0 : index
    %46 = vector.load %arg2[%c48, %c0_20] : memref<112x128xf32, #tpu.memory_space<vmem>>, vector<32x32xf32>
    %c10 = arith.constant 10 : index
    %c0_21 = arith.constant 0 : index
    %47 = vector.load %arg2[%c10, %c0_21] : memref<112x128xf32, #tpu.memory_space<vmem>>, vector<1x32xf32>
    %cst_22 = arith.constant dense<0.000000e+00> : vector<2x32xf32>
    %48 = tpu.matmul %44, %45, %cst_22 {dimension_numbers = #tpu.dot_dimension_numbers<[1], [0], [0], [1], [0, 0, 1, 1], [], []>} : vector<2x32xf32>, vector<32x32xf32>, vector<2x32xf32> -> vector<2x32xf32>
    %cst_23 = arith.constant dense<0.000000e+00> : vector<2x32xf32>
    %49 = tpu.matmul %33, %46, %cst_23 {dimension_numbers = #tpu.dot_dimension_numbers<[1], [0], [0], [1], [0, 0, 1, 1], [], []>} : vector<2x32xf32>, vector<32x32xf32>, vector<2x32xf32> -> vector<2x32xf32>
    %50 = arith.addf %48, %49 : vector<2x32xf32>
    %51 = vector.broadcast %47 : vector<1x32xf32> to vector<2x32xf32>
    %52 = arith.addf %50, %51 : vector<2x32xf32>
    %cst_24 = arith.constant 0.000000e+00 : f32
    %53 = vector.broadcast %cst_24 : f32 to vector<2x32xf32>
    %54 = arith.maximumf %52, %53 : vector<2x32xf32>
    %c80 = arith.constant 80 : index
    %c0_25 = arith.constant 0 : index
    %55 = vector.load %arg2[%c80, %c0_25] : memref<112x128xf32, #tpu.memory_space<vmem>>, vector<32x4xf32>
    %c11 = arith.constant 11 : index
    %c0_26 = arith.constant 0 : index
    %56 = vector.load %arg2[%c11, %c0_26] : memref<112x128xf32, #tpu.memory_space<vmem>>, vector<1x4xf32>
    %cst_27 = arith.constant dense<0.000000e+00> : vector<2x4xf32>
    %57 = tpu.matmul %54, %55, %cst_27 {dimension_numbers = #tpu.dot_dimension_numbers<[1], [0], [0], [1], [0, 0, 1, 1], [], []>} : vector<2x32xf32>, vector<32x4xf32>, vector<2x4xf32> -> vector<2x4xf32>
    %58 = vector.broadcast %56 : vector<1x4xf32> to vector<2x4xf32>
    %59 = arith.addf %57, %58 : vector<2x4xf32>
    %cst_28 = arith.constant dense<0xFF800000> : vector<2xf32>
    %60 = vector.multi_reduction <maximumf>, %59, %cst_28 [1] : vector<2x4xf32> to vector<2xf32>
    %61 = vector.shape_cast %60 : vector<2xf32> to vector<2x1xf32>
    %62 = vector.broadcast %61 : vector<2x1xf32> to vector<2x4xf32>
    %63 = arith.subf %59, %62 : vector<2x4xf32>
    %64 = math.exp %63 : vector<2x4xf32>
    %cst_29 = arith.constant dense<0.000000e+00> : vector<2xf32>
    %65 = vector.multi_reduction <add>, %64, %cst_29 [1] : vector<2x4xf32> to vector<2xf32>
    %66 = vector.shape_cast %65 : vector<2xf32> to vector<2x1xf32>
    %67 = math.log %66 : vector<2x1xf32>
    %68 = vector.broadcast %67 : vector<2x1xf32> to vector<2x4xf32>
    %69 = arith.subf %63, %68 : vector<2x4xf32>
    %c0_30 = arith.constant 0 : index
    %c0_31 = arith.constant 0 : index
    %70 = vector.load %arg3[%c0_30, %c0_31] : memref<2x4xf32, #tpu.memory_space<vmem>>, vector<2x4xf32>
    tpu.vector_store %arg3[%c0_30, %c0_31], %69 {strides = array<i32>} : memref<2x4xf32, #tpu.memory_space<vmem>>, vector<2x4xf32>,
    return
  }
}

</mosaic_0001>

<bundles_post_ra>
// kernel: tpu_custom_call.1
= control target key start
LH: loop header
LB: loop body
LE: loop exit
PB: predicated region body
PF: predicated region fallthrough
CT: control target
= control target key end

     0   :  { %8 = vsyncpa [#allocation3], 0  ;;  %s1018_s0 = inlined_call_operand.vmem [shape: f32[16,8], index: 0, kind: input, shape index: {}]   ;;  %s1019_s1 = inlined_call_operand.vmem [shape: f32[16,20], index: 1, kind: input, shape index: {}]   ;;  %s1020_s2 = inlined_call_operand.hbm [shape: f32[112,128], index: 2, kind: input, shape index: {}]   ;;  %s1021_s3 = inlined_call_operand.hbm [shape: f32[2,4], index: 3, kind: output, shape index: {}]  }
   0x1   :  { %9 = vsyncpa [#allocation4], 0  ;;  %s924_s12 = smov [#allocation2]  }
   0x2   :  { %s19_s13 = sshll.u32 %s924_s12, 4  ;;  %s20_s13 = int_to_ptr.vmem [resolvable:$true] %s19_s13 }
   0x3   :  { %s888_s14 = scalar_lea.vmem %s20_s13, 1792  ;;  %p893_p1 = scmp.lt.s32.totalorder %s20_s13, %s20_s13 }
   0x4   :  { %p889_p0 = scmp.ne.s32.totalorder %s20_s13, %s888_s14  ;;  %p894_p2 = scmp.lt.s32.totalorder %s888_s14, %s888_s14 }
   0x6   :  { %p895_p3 = por %p894_p2, %p893_p1 }
   0x8   :  { %p896_p4 = pnand %p895_p3, %p889_p0 }
   0xa   :  { %899 = shalt.err (!%p896_p4)
}
   0xb   :  { %s925_s15 = smov 128   ;;  %s926_s16 = smov 8  }
   0xc   :  { %25 = dma.hbm_to_vmem [thread:$0]  %s1020_s2, 1792, %s20_s13, [#allocation3], %s925_s15, %s925_s15, %s926_s16  }
   0xd   :  { %920 = dma.done.wait [#allocation3], 1792  }
   0xe   :  { %921 = vsyncadd [#allocation3], 4294965504  ;;  %vm32_vm0 = vcmask 64512   ;;  %v29_v0 = vld [vmem:[#allocation2] sm:$0xff]  ;;  %v31_v2 = vld [vmem:[%s1018_s0 + $0x8] sm:$0xff]  ;;  %v927_v3 = vmov 0.0   ;;  %v203_v8 = vlaneseq }
   0xf   :  { %v30_v1 = vld [vmem:[%s1018_s0] sm:$0xff]  ;;  %795 = vmatprep.subr.mxu0 %v29_v0  ;;  %800 = vmatprep.subr.mxu1 %v927_v3  ;;  %v928_v4 = vmov 32   ;;  %vm929_vm1 = vmmov 0   ;;  %vm115_vm2 = vcmask 261120   ;;  %v114_v7 = vld [vmem:[#allocation2 + $0x8] sm:$0x1] }
  0x10   :  { %797 = vmatprep.mubr.msk.f32.mxu0 %vm32_vm0, %v30_v1  ;;  %796 = vmatpush3.msra.mxu0 %v29_v0  ;;  %v204_v9 = vshrl.u32 %v203_v8, 7  ;;  %v213_v20 = vld [vmem:[%s1019_s1] sm:$0xff]  ;;  %vm217_vm3 = vcmask 130048   ;;  %v214_v23 = vld [vmem:[%s1019_s1 + $0x8] sm:$0xff]  ;;  %s930_s1 = smov 112   ;;  %v931_v38 = vmov 18  }
  0x11   :  { %798 = vmatmul.mubr.msk.f32.vlgmr.msra.gmra.mxu0 %vm32_vm0, %v31_v2  ;;  %864 = vset.pattern.permute.xlu0 %v928_v4  ;;  %v932_v39 = vmov 19   ;;  %v488_v48 = vld [vmem:[#allocation2 + $0x48] sm:$0xff]  ;;  %v487_v49 = vld [vmem:[#allocation2 + $0x40] sm:$0xff]  ;;  %v486_v50 = vld [vmem:[#allocation2 + $0x38] sm:$0xff]  ;;  %vm479_vm4 = vcmask 1040384   ;;  %vm724_vm5 = vcmask 25600  }
  0x12   :  { %804 = vmatprep.mubr.msk.f32.mxu1 %vm929_vm1, %v927_v3  ;;  %v205_v11 = vsub.s32 0, %v204_v9  ;;  %v758_v54 = vld [vmem:[#allocation2 + $0x9] ss:$0 sm:$0xff]  ;;  %s933_s25 = smov [#allocation5]  }
  0x13   :  { %v484_v1 = vld [vmem:[#allocation2 + $0x28] sm:$0xff]  ;;  %s744_s26 = sshll.u32 %s933_s25, 4  ;;  %s745_s26 = int_to_ptr.vmem [resolvable:$true] %s744_s26 }
  0x14   :  { %s900_s27 = scalar_lea.vmem %s745_s26, 32  ;;  %p905_p6 = scmp.lt.s32.totalorder %s745_s26, %s745_s26 }
  0x15   :  { %p901_p5 = scmp.ne.s32.totalorder %s745_s26, %s900_s27  ;;  %p906_p7 = scmp.lt.s32.totalorder %s900_s27, %s900_s27 }
  0x17   :  { %p907_p8 = por %p906_p7, %p905_p6 }
  0x19   :  { %p908_p9 = pnand %p907_p8, %p901_p5 }
  0xd1   :  { %v799_v5 = vpop.f32.mrf.mxu0 }
  0xd2   :  { %801 = vmatpush3.xpose.msk.msra.mxu1 %vm115_vm2, %v799_v5  ;;  %807 = vmatprep.subr.mxu0 %v799_v5 }
  0xd3   :  { %v105_v6 = vpop.f32.mrf.mxu0  ;;  %808 = vmatpush3.msra.mxu0 %v799_v5  ;;  %802 = vmatprep.subr.mxu1 %v927_v3 }
  0xd4   :  { %196 = vperm.xlu0 %864, %v105_v6   ;;  %809 = vmatprep.subr.mxu0 %v105_v6 }
  0xd5   :  { %810 = vmatpush3.msra.mxu0 %v105_v6 }
  0xd6   :  { %803 = vmatpush3.xpose.msk.msra.mxu1 %vm115_vm2, %v105_v6  ;;  %814 = vmatprep.subr.mxu0 %v927_v3 }
  0xd7   :  { %821 = vmatprep.subr.mxu1 %v927_v3 }
  0xd8   :  { %200 = vperm.xlu0 %864, %v799_v5   ;;  %v483_v5 = vld [vmem:[#allocation2 + $0x20] sm:$0xff] }
  0xd9   :  { %805 = vmatmul.mubr.msk.f32.vlgmr.msra.gmra.mxu1 %vm115_vm2, %v114_v7 }
  0xda   :  { %829 = vmatprep.mubr.msk.f32.mxu1 %vm929_vm1, %v927_v3  ;;  %822 = vmatpush3.msra.mxu1 %v488_v48 }
  0xdb   :  { %823 = vmatprep.subr.mxu1 %v927_v3 }
  0xdc   :  { %865 = vset.pattern.permute.xlu0 %v931_v38  ;;  %824 = vmatpush3.msra.mxu1 %v487_v49 }
  0xdd   :  { %825 = vmatprep.subr.mxu1 %v927_v3 }
  0xde   :  { %826 = vmatpush3.msra.mxu1 %v486_v50 }
  0xdf   :  { %827 = vmatprep.subr.mxu1 %v927_v3 }
 0x14f   :  { %v197_v10 = vpop.permute.xlu0 %196 }
 0x153   :  { %v201_v14 = vpop.permute.xlu0 %200 }
 0x199   :  { %v191_v12 = vpop.f32.mrf.mxu1 }
 0x19a   :  { %v206_v13 = vrot.slane %v191_v12, %v205_v11  ;;  %v482_v12 = vld [vmem:[#allocation2 + $0x18] sm:$0xff] }
 0x19b   :  { %v806_v15 = vpop.f32.mrf.mxu1 }
 0x19c   :  { %v207_v16 = vadd.f32 %v206_v13, %v197_v10  ;;  %v208_v17 = vadd.f32 %v206_v13, %v201_v14  ;;  %v481_v15 = vld [vmem:[#allocation2 + $0x10] sm:$0xff] }
 0x19e   :  { %v209_v18 = vmul.f32 0.2, %v207_v16  ;;  %v210_v19 = vmul.f32 0.2, %v208_v17 }
 0x1a0   :  { %v211_v21 = vmax.f32 %v207_v16, %v209_v18  ;;  %v212_v22 = vmax.f32 %v208_v17, %v210_v19 }
 0x1a2   :  { %v215_v24 = vadd.f32 %v213_v20, %v211_v21  ;;  %v216_v26 = vadd.f32 %v214_v23, %v212_v22 }
 0x1a4   :  { %v218_v25 = vsel %vm217_vm3, %v215_v24, -inf  ;;  %v221_v27 = vsel %vm217_vm3, %v216_v26, -inf }
 0x1a5   :  { %219 = vmax.xlane.f32.xlu1 %v218_v25 }
 0x1a9   :  { %222 = vmax.xlane.f32.xlu1 %v221_v27  ;;  %v485_v27 = vld [vmem:[#allocation2 + $0x30] sm:$0xff] }
 0x1aa   :  { %828 = vmatpush3.msra.mxu1 %v485_v27 }
 0x1ab   :  { %843 = vmatprep.subr.mxu1 %v927_v3 }
 0x22e   :  { %v220_v28 = vpop.xlane.xlu1 %219 }
 0x22f   :  { %v224_v29 = vsub.f32 %v215_v24, %v220_v28 }
 0x231   :  { %v226_v30 = vmul.f32 1.442695, %v224_v29 }
 0x232   :  { %v223_v31 = vpop.xlane.xlu1 %222 }
 0x233   :  { %868 = vpow2.f32 %v226_v30  ;;  %v225_v32 = vsub.f32 %v216_v26, %v223_v31 }
 0x235   :  { %v228_v33 = vmul.f32 1.442695, %v225_v32  ;;  %v645_v32 = vld [vmem:[#allocation2 + $0x68] sm:$0xff] }
 0x237   :  { %870 = vpow2.f32 %v228_v33  ;;  %v644_v33 = vld [vmem:[#allocation2 + $0x60] sm:$0xff] }
 0x240   :  { %v869_v34 = vpop.eup %868 }
 0x241   :  { %v230_v35 = vsel %vm217_vm3, %v869_v34, 0.0 }
 0x242   :  { %231 = vadd.xlane.f32.xlu0 %v230_v35  ;;  %v642_v35 = vld [vmem:[#allocation2 + $0x50] sm:$0xff] }
 0x244   :  { %v871_v36 = vpop.eup %870 }
 0x245   :  { %v233_v37 = vsel %vm217_vm3, %v871_v36, 0.0 }
 0x246   :  { %234 = vadd.xlane.f32.xlu1 %v233_v37 }
 0x257   :  { %330 = vrot.lane.b32.xlu1 %v213_v20, %s930_s1 }
 0x258   :  { %442 = vperm.xlu0 %865, %v213_v20  }
 0x25b   :  { %332 = vrot.lane.b32.xlu1 %v214_v23, %s930_s1 }
 0x25c   :  { %867 = vset.pattern.permute.xlu0 %v932_v39 }
 0x25d   :  { %461 = vperm.xlu0 %867, %v213_v20  }
 0x261   :  { %465 = vperm.xlu0 %867, %v214_v23  }
 0x2cb   :  { %v232_v40 = vpop.xlane.xlu0 %231 }
 0x2cc   :  { %872 = vrcp.f32 %v232_v40 }
 0x2cf   :  { %v235_v41 = vpop.xlane.xlu1 %234 }
 0x2d0   :  { %874 = vrcp.f32 %v235_v41 }
 0x2d3   :  { %v331_v42 = vpop.permute.xlu1 %330  ;;  %v443_v51 = vpop.permute.xlu0 %442 }
 0x2d4   :  { %336 = vxpose.xlu1.b32.start [1/2] (short) (narrow) %v331_v42, 8  ;;  %v765_v42 = vld [vmem:[#allocation2 + $0xb] ss:$0 sm:$0xff] }
 0x2d7   :  { %v333_v43 = vpop.permute.xlu1 %332 }
 0x2d8   :  { %337 = vxpose.xlu1.b32.end [2/2] (short) (narrow) %v333_v43, 8  ;;  %v462_v52 = vpop.permute.xlu0 %461 }
 0x2d9   :  { %v873_v44 = vpop.eup %872 }
 0x2da   :  { %v238_v45 = vmul.f32 %v873_v44, %v869_v34  ;;  %v643_v34 = vld [vmem:[#allocation2 + $0x58] sm:$0xff] }
 0x2dc   :  { %811 = vmatprep.mubr.msk.f32.mxu0 %vm217_vm3, %v238_v45  ;;  %v466_v57 = vpop.permute.xlu0 %465 }
 0x2dd   :  { %v875_v46 = vpop.eup %874 }
 0x2de   :  { %v239_v47 = vmul.f32 %v875_v46, %v871_v36  ;;  %v764_v36 = vld [vmem:[#allocation2 + $0xa] ss:$0 sm:$0xff] }
 0x2e0   :  { %812 = vmatmul.mubr.msk.f32.vlgmr.msra.gmra.mxu0 %vm217_vm3, %v239_v47 }
 0x2e1   :  { %818 = vmatprep.mubr.msk.f32.mxu0 %vm929_vm1, %v927_v3 }
 0x2f6   :  { %866 = vset.pattern.permute.xlu1 %v931_v38 }
 0x2f7   :  { %446 = vperm.xlu1 %866, %v214_v23  }
 0x350   :  { %v352_v53 = vpop.trf.xlu1 }
 0x372   :  { %v447_v59 = vpop.permute.xlu1 %446 }
 0x3a0   :  { %v813_v55 = vpop.f32.mrf.mxu0 }
 0x3a1   :  { %v323_v56 = vadd.f32 %v813_v55, %v758_v54 }
 0x3a2   :  { %v317_v58 = vpop.f32.mrf.mxu0 }
 0x3a3   :  { %v327_v60 = vmax.f32 %v323_v56, 0.0  ;;  %v318_v61 = vadd.f32 %v758_v54, %v317_v58 }
 0x3a5   :  { %v326_v62 = vmax.f32 %v318_v61, 0.0  ;;  %v469_v63 = vadd.f32 %v466_v57, %v327_v60  ;;  %v450_v0 = vadd.f32 %v447_v59, %v327_v60  ;;  %815 = vmatpush3.msra.mxu0 %v327_v60 }
 0x3a6   :  { %816 = vmatprep.subr.mxu0 %v927_v3 }
 0x3a7   :  { %v449_v2 = vadd.f32 %v443_v51, %v326_v62  ;;  %v468_v4 = vadd.f32 %v462_v52, %v326_v62  ;;  %817 = vmatpush3.msra.mxu0 %v326_v62  ;;  %v471_v7 = vsel %vm115_vm2, %v469_v63, -inf  ;;  %v452_v9 = vsel %vm115_vm2, %v450_v0, -inf }
 0x3a8   :  { %819 = vmatmul.mubr.msk.f32.vlgmr.msra.gmra.mxu0 %vm217_vm3, %v352_v53  ;;  %832 = vmatprep.subr.mxu0 %v927_v3 }
 0x3a9   :  { %v470_v6 = vsel %vm115_vm2, %v468_v4, -inf  ;;  %v451_v8 = vsel %vm115_vm2, %v449_v2, -inf  ;;  %833 = vmatpush3.msra.mxu0 %v484_v1  ;;  %840 = vmatprep.mubr.msk.f32.mxu0 %vm929_vm1, %v927_v3 }
 0x3aa   :  { %v472_v10 = vmax.f32 %v470_v6, %v471_v7  ;;  %v453_v11 = vmax.f32 %v451_v8, %v452_v9  ;;  %834 = vmatprep.subr.mxu0 %v927_v3 }
 0x3ab   :  { %835 = vmatpush3.msra.mxu0 %v483_v5 }
 0x3ac   :  { %v473_v13 = vrot.slane %v472_v10, 4  ;;  %v454_v14 = vrot.slane %v453_v11, 4  ;;  %836 = vmatprep.subr.mxu0 %v927_v3 }
 0x3ad   :  { %837 = vmatpush3.msra.mxu0 %v482_v12 }
 0x3ae   :  { %v474_v16 = vmax.f32 %v472_v10, %v473_v13  ;;  %v455_v17 = vmax.f32 %v453_v11, %v454_v14  ;;  %838 = vmatprep.subr.mxu0 %v927_v3 }
 0x3af   :  { %839 = vmatpush3.msra.mxu0 %v481_v15 }
 0x3b0   :  { %v475_v18 = vrot.slane %v474_v16, 2  ;;  %v456_v19 = vrot.slane %v455_v17, 2 }
 0x3b2   :  { %v476_v20 = vmax.f32 %v474_v16, %v475_v18  ;;  %v457_v21 = vmax.f32 %v455_v17, %v456_v19 }
 0x3b4   :  { %v477_v22 = vrot.slane %v476_v20, 1  ;;  %v458_v23 = vrot.slane %v457_v21, 1 }
 0x3b6   :  { %v478_v24 = vmax.f32 %v476_v20, %v477_v22  ;;  %v459_v25 = vmax.f32 %v457_v21, %v458_v23 }
 0x3b8   :  { %v480_v26 = vsel %vm479_vm4, %v459_v25, %v478_v24 }
 0x3b9   :  { %841 = vmatmul.mubr.msk.f32.vlgmr.msra.gmra.mxu0 %vm115_vm2, %v480_v26 }
 0x468   :  { %v437_v28 = vpop.f32.mrf.mxu0 }
 0x469   :  { %830 = vmatmul.mubr.msk.f32.vlgmr.msra.gmra.mxu1 %vm115_vm2, %v437_v28 }
 0x46a   :  { %v820_v29 = vpop.f32.mrf.mxu0  ;;  %851 = vmatprep.mubr.msk.f32.mxu1 %vm929_vm1, %v927_v3  ;;  %844 = vmatpush3.msra.mxu1 %v645_v32 }
 0x46b   :  { %845 = vmatprep.subr.mxu1 %v927_v3 }
 0x46c   :  { %846 = vmatpush3.msra.mxu1 %v644_v33 }
 0x46d   :  { %847 = vmatprep.subr.mxu1 %v927_v3 }
 0x46e   :  { %848 = vmatpush3.msra.mxu1 %v643_v34 }
 0x46f   :  { %849 = vmatprep.subr.mxu1 %v927_v3 }
 0x470   :  { %850 = vmatpush3.msra.mxu1 %v642_v35 }
 0x479   :  { %v632_v30 = vpop.f32.mrf.mxu0 }
 0x47b   :  { %v842_v31 = vpop.f32.mrf.mxu0 }
 0x529   :  { %v559_v37 = vpop.f32.mrf.mxu1 }
 0x52a   :  { %v633_v38 = vadd.f32 %v632_v30, %v559_v37 }
 0x52b   :  { %v831_v39 = vpop.f32.mrf.mxu1 }
 0x52c   :  { %v640_v40 = vadd.f32 %v764_v36, %v633_v38 }
 0x52e   :  { %v641_v41 = vmax.f32 %v640_v40, 0.0 }
 0x530   :  { %852 = vmatmul.mubr.msk.f32.vlgmr.msra.gmra.mxu1 %vm115_vm2, %v641_v41 }
 0x5f0   :  { %v720_v43 = vpop.f32.mrf.mxu1 }
 0x5f1   :  { %v721_v44 = vadd.f32 %v765_v42, %v720_v43 }
 0x5f2   :  { %v853_v45 = vpop.f32.mrf.mxu1 }
 0x5f3   :  { %v725_v46 = vsel %vm724_vm5, %v721_v44, -inf }
 0x5f4   :  { %726 = vmax.xlane.f32.xlu0 %v725_v46 }
 0x67d   :  { %v727_v47 = vpop.xlane.xlu0 %726 }
 0x67e   :  { %v728_v3 = vsub.f32 %v721_v44, %v727_v47 }
 0x680   :  { %v729_v48 = vmul.f32 1.442695, %v728_v3 }
 0x682   :  { %876 = vpow2.f32 %v729_v48 }
 0x68f   :  { %v877_v49 = vpop.eup %876 }
 0x690   :  { %v731_v50 = vsel %vm724_vm5, %v877_v49, 0.0 }
 0x691   :  { %732 = vadd.xlane.f32.xlu1 %v731_v50 }
 0x71a   :  { %v733_v51 = vpop.xlane.xlu1 %732 }
 0x71b   :  { %878 = vlog2.f32 %v733_v51 }
 0x728   :  { %v879_v52 = vpop.eup %878 }
 0x729   :  { %v735_v53 = vmul.f32 0.6931472, %v879_v52 }
 0x72b   :  { %v736_v54 = vsub.f32 %v728_v3, %v735_v53 }
 0x72d   :  { %737 = vst.msk [vmem:[#allocation5] sm:$0x3] %vm724_vm5, %v736_v54 }
 0x72e   :  { %911 = shalt.err (!%p908_p9)
}
 0x72f   :  { %747 = dma.vmem_to_hbm [thread:$0]  %s745_s26, 32, %s1021_s3, [#allocation4]  }
 0x730   :  { %922 = dma.done.wait [#allocation4], 32  }
 0x731   :  { %923 = vsyncadd [#allocation4], 4294967264 }
 0x732   :  { %751 = vsyncpa [#allocation3], 1 }
 0x733   :  { %752 = vsyncpa [#allocation4], 1 }

</bundles_post_ra>
